<compile_context>
chip_gen: v5e
topology: v5e:2x2
jax: 0.10.0
libtpu: 0.0.40
codegen_flags: <defaults>
</compile_context>

<pallas_src>
import math

import jax
import jax.numpy as jnp
from jax.experimental import pallas as pl
from jax.experimental.pallas import tpu as pltpu

ONED_SIZE = 10
CONV_C = 6                        # Conv1d out channels
KSIZE = 3                         # Conv1d kernel size
CONCAT_LEN = 2 * ONED_SIZE + 1    # len(a) + len(b) + len(pos) = 21
CONV_T = CONCAT_LEN - KSIZE + 1   # 19
FLAT = CONV_C * CONV_T            # 114
HID = 128 if ONED_SIZE == 10 else 64
LANES = 128                       # lane width of all in-kernel row vectors
NEG_SLOPE = 0.01                  # F.leaky_relu default

assert FLAT <= LANES and HID == LANES


def _round_up(n, m):
    return ((n + m - 1) // m) * m


def _leaky_relu(x):
    # identical to leaky_relu for 0 < slope < 1; mul+max (2 VALU ops)
    return jnp.maximum(x, NEG_SLOPE * x)


# ------------------------------- kernel --------------------------------------

def _forward_kernel(x_ref, w_ref, misc_ref, out_ref):
    # x_ref:    (TB, 128)  lanes 0..20 = cat(a, b, pos), lanes 21..127 zero
    # w_ref:    (3, 128, 128) = [conv-matrix, W2^T (rows>=114 zero), W3^T]
    # misc_ref: (8, 128)   rows: 0=conv bias row, 1=b2, 2=b3, 3=w4 row,
    #                      4[lane0]=b4, rest zero
    # out_ref:  (TB, 1)
    x = x_ref[...]

    # Conv1d(1->6, k=3) + channel-major flatten as one MXU matmul.
    # flat lane 19*c + t = leaky(sum_k w[c,k] * x[t+k] + b[c]); lanes>=114 stay 0.
    flat = _leaky_relu(
        jnp.dot(x, w_ref[0], preferred_element_type=jnp.float32)
        + misc_ref[0:1, :])

    # Linear(114 -> 128): full-granule MXU matmul (W2^T zero-row-padded).
    h = _leaky_relu(
        jnp.dot(flat, w_ref[1], preferred_element_type=jnp.float32)
        + misc_ref[1:2, :])

    # Linear(128 -> 128)
    h = _leaky_relu(
        jnp.dot(h, w_ref[2], preferred_element_type=jnp.float32)
        + misc_ref[2:3, :])

    # Linear(128 -> 1) on VPU (mul) + XLU (cross-lane reduce): avoids an
    # M=N=1 MXU round trip on the critical path.
    out_ref[...] = (jnp.sum(h * misc_ref[3:4, :], axis=-1, keepdims=True)
                    + misc_ref[4:5, 0:1])


# ----------------------- one-time parameter re-layout ------------------------

def prepare_params(params):
    """PyTorch-layout params -> packed kernel-layout params (call once)."""
    w1 = params["w1"].reshape(CONV_C, KSIZE).astype(jnp.float32)
    b1 = params["b1"].reshape(CONV_C).astype(jnp.float32)

    # Conv1d + flatten as a matrix: cmat[t + k, 19*c + t] = w1[c, k]
    cmat = jnp.zeros((LANES, LANES), jnp.float32)
    t = jnp.arange(CONV_T)
    for c in range(CONV_C):
        for k in range(KSIZE):
            cmat = cmat.at[t + k, c * CONV_T + t].add(w1[c, k])

    # Conv bias broadcast along the flattened (channel-major) lane axis.
    bconv_row = jnp.zeros((LANES,), jnp.float32)
    for c in range(CONV_C):
        bconv_row = bconv_row.at[c * CONV_T:(c + 1) * CONV_T].set(b1[c])

    w2t = params["w2"].T.astype(jnp.float32)                       # (114, 128)
    w2p = jnp.zeros((LANES, HID), jnp.float32).at[:FLAT, :].set(w2t)
    w3t = params["w3"].T.astype(jnp.float32)                       # (128, 128)

    w_stack = jnp.stack([cmat, w2p, w3t], axis=0)                  # (3, 128, 128)

    misc = jnp.zeros((8, LANES), jnp.float32)
    misc = misc.at[0, :].set(bconv_row)
    misc = misc.at[1, :].set(params["b2"].reshape(-1).astype(jnp.float32))
    misc = misc.at[2, :].set(params["b3"].reshape(-1).astype(jnp.float32))
    misc = misc.at[3, :].set(params["w4"].reshape(-1).astype(jnp.float32))
    misc = misc.at[4, 0].set(params["b4"].reshape(-1)[0].astype(jnp.float32))

    return {"w_stack": w_stack, "misc": misc}


# ------------------------------ forward call ----------------------------------

def _pallas_forward(x, kparams, *, batch_tile=128):
    """x: (B, 21) rows of cat(a, b, pos).  Returns (B, 1)."""
    B, L = x.shape
    tb = _round_up(min(batch_tile, _round_up(B, 8)), 8)   # sublane-aligned tile
    bp = _round_up(B, tb)
    # Single wrapper pad (rows to tile multiple, lanes to 128); fused into the
    # pallas call via allow_input_fusion.
    x = jnp.pad(x.astype(jnp.float32), ((0, bp - B), (0, LANES - L)))

    out = pl.pallas_call(
        _forward_kernel,
        out_shape=jax.ShapeDtypeStruct((bp, 1), jnp.float32),
        grid=(bp // tb,),
        in_specs=[
            pl.BlockSpec((tb, LANES), lambda i: (i, 0)),           # x tile
            pl.BlockSpec((3, LANES, LANES), lambda i: (0, 0, 0)),  # weights (resident)
            pl.BlockSpec((8, LANES), lambda i: (0, 0)),            # biases/w4/b4
        ],
        out_specs=pl.BlockSpec((tb, 1), lambda i: (i, 0)),
        compiler_params=pltpu.CompilerParams(
            dimension_semantics=("parallel",),
            allow_input_fusion=[True, False, False],
        ),
    )(x, kparams["w_stack"], kparams["misc"])
    return out[:B]


def simple_connected_multiple_forward(a, b, pos, kparams):
    """Single-sample forward, matching the PyTorch module exactly: returns (1,)."""
    x = jnp.concatenate([a.reshape(-1), b.reshape(-1), pos.reshape(-1)])
    out = _pallas_forward(x.reshape(1, CONCAT_LEN), kparams)
    return out.reshape(1)


def simple_connected_multiple_forward_batched(a, b, pos, kparams, *, batch_tile=128):
    """Batched forward: a,b: (B, 10), pos: (B, 1).  Returns (B, 1).

    Amortizes dispatch / DMA overhead across B samples and (via the parallel
    grid) uses both TensorCores on v7x for large B.
    """
    B = a.shape[0]
    x = jnp.concatenate(
        [a.reshape(B, -1), b.reshape(B, -1), pos.reshape(B, -1)], axis=-1)
    return _pallas_forward(x, kparams, batch_tile=batch_tile)


# --------------------- deterministic parameter init ---------------------------

def _xavier_uniform(key, shape, fan_in, fan_out):
    bound = math.sqrt(6.0 / (fan_in + fan_out))
    return jax.random.uniform(key, shape, jnp.float32, -bound, bound)


def _bias_uniform(key, shape, fan_in):
    bound = 1.0 / math.sqrt(fan_in)
    return jax.random.uniform(key, shape, jnp.float32, -bound, bound)


def init_params(key):
    ks = jax.random.split(key, 8)
    return {
        # Conv1d(1, 6, 3): weight (6, 1, 3), bias (6,)
        "w1": _xavier_uniform(ks[0], (CONV_C, 1, KSIZE), fan_in=1 * KSIZE,
                              fan_out=CONV_C * KSIZE),
        "b1": _bias_uniform(ks[1], (CONV_C,), fan_in=1 * KSIZE),
        # Linear(114, 128)
        "w2": _xavier_uniform(ks[2], (HID, FLAT), fan_in=FLAT, fan_out=HID),
        "b2": _bias_uniform(ks[3], (HID,), fan_in=FLAT),
        # Linear(128, 128)
        "w3": _xavier_uniform(ks[4], (HID, HID), fan_in=HID, fan_out=HID),
        "b3": _bias_uniform(ks[5], (HID,), fan_in=HID),
        # Linear(128, 1)
        "w4": _xavier_uniform(ks[6], (1, HID), fan_in=HID, fan_out=1),
        "b4": _bias_uniform(ks[7], (1,), fan_in=HID),
    }


# --------------------------- pure-JAX reference --------------------------------

def reference_forward(a, b, pos, params):
    x = jnp.concatenate([a.reshape(-1), b.reshape(-1), pos.reshape(-1)])
    patches = jnp.stack([x[k:k + CONV_T] for k in range(KSIZE)], axis=0)
    conv = params["w1"].reshape(CONV_C, KSIZE) @ patches + params["b1"][:, None]
    h = jax.nn.leaky_relu(conv, NEG_SLOPE).reshape(-1)          # torch .flatten()
    h = jax.nn.leaky_relu(h @ params["w2"].T + params["b2"], NEG_SLOPE)
    h = jax.nn.leaky_relu(h @ params["w3"].T + params["b3"], NEG_SLOPE)
    return h @ params["w4"].T + params["b4"]                    # (1,)


if __name__ == "__main__":
    key = jax.random.PRNGKey(0)
    kp, ka, kb, kpos = jax.random.split(key, 4)

    params = init_params(kp)
    kparams = prepare_params(params)                            # one-time relayout

    # ---- single-sample (module-exact semantics) ----
    a = jax.random.normal(ka, (ONED_SIZE,), jnp.float32)        # (10,)
    b = jax.random.normal(kb, (ONED_SIZE,), jnp.float32)        # (10,)
    pos = jax.random.normal(kpos, (1,), jnp.float32)            # (1,)

    fwd = jax.jit(simple_connected_multiple_forward)
    out = jax.block_until_ready(fwd(a, b, pos, kparams))
    ref = jax.block_until_ready(reference_forward(a, b, pos, params))
    assert out.shape == (1,), out.shape
    # Tolerance covers MXU default-precision f32 matmuls on real hardware.
    assert jnp.allclose(out, ref, atol=2e-2, rtol=2e-2), (out, ref)

    # ---- batched (amortizes dispatch/DMA; parallel grid over batch tiles) ----
    B = 8
    kab, kbb, kpb = jax.random.split(jax.random.PRNGKey(1), 3)
    A = jax.random.normal(kab, (B, ONED_SIZE), jnp.float32)
    Bv = jax.random.normal(kbb, (B, ONED_SIZE), jnp.float32)
    P = jax.random.normal(kpb, (B, 1), jnp.float32)

    fwd_b = jax.jit(simple_connected_multiple_forward_batched)
    outb = jax.block_until_ready(fwd_b(A, Bv, P, kparams))
    refb = jax.block_until_ready(
        jax.vmap(lambda aa, bb, pp: reference_forward(aa, bb, pp, params))(A, Bv, P))
    assert outb.shape == (B, 1), outb.shape
    assert jnp.allclose(outb, refb, atol=2e-2, rtol=2e-2), (outb, refb)

    print("KERNEL_OK")
</pallas_src>

<mosaic_0001>
module attributes {stable_mosaic.version = 11 : i64} {
  func.func @_forward_kernel(%arg0: i32, %arg1: memref<8x128xf32, #tpu.memory_space<vmem>>, %arg2: memref<3x128x128xf32, #tpu.memory_space<vmem>>, %arg3: memref<8x128xf32, #tpu.memory_space<vmem>>, %arg4: memref<8x1xf32, #tpu.memory_space<vmem>>) attributes {dimension_semantics = [#tpu.dimension_semantics<parallel>], iteration_bounds = array<i64: 1>, scalar_prefetch = 0 : i64, scratch_operands = 0 : i64, tpu.core_type = #tpu.core_type<tc>, window_params = [{transform_indices = @transform_0, window_bounds = array<i64: 8, 128>}, {pipeline_mode = #tpu.pipeline_mode<synchronous>, transform_indices = @transform_1, window_bounds = array<i64: 3, 128, 128>}, {pipeline_mode = #tpu.pipeline_mode<synchronous>, transform_indices = @transform_2, window_bounds = array<i64: 8, 128>}, {transform_indices = @transform_3, window_bounds = array<i64: 8, 1>}]} {
    %c0 = arith.constant 0 : index
    %c0_0 = arith.constant 0 : index
    %0 = vector.load %arg1[%c0, %c0_0] : memref<8x128xf32, #tpu.memory_space<vmem>>, vector<8x128xf32>
    %c0_1 = arith.constant 0 : index
    %c0_2 = arith.constant 0 : index
    %c0_3 = arith.constant 0 : index
    %1 = vector.load %arg2[%c0_1, %c0_2, %c0_3] : memref<3x128x128xf32, #tpu.memory_space<vmem>>, vector<1x128x128xf32>
    %2 = vector.shape_cast %1 : vector<1x128x128xf32> to vector<128x128xf32>
    %cst = arith.constant dense<0.000000e+00> : vector<8x128xf32>
    %3 = tpu.matmul %0, %2, %cst {dimension_numbers = #tpu.dot_dimension_numbers<[1], [0], [0], [1], [0, 0, 1, 1], [], []>} : vector<8x128xf32>, vector<128x128xf32>, vector<8x128xf32> -> vector<8x128xf32>
    %c0_4 = arith.constant 0 : index
    %c0_5 = arith.constant 0 : index
    %4 = vector.load %arg3[%c0_4, %c0_5] : memref<8x128xf32, #tpu.memory_space<vmem>>, vector<1x128xf32>
    %5 = vector.broadcast %4 : vector<1x128xf32> to vector<8x128xf32>
    %6 = arith.addf %3, %5 : vector<8x128xf32>
    %cst_6 = arith.constant 0.00999999977 : f32
    %7 = vector.broadcast %cst_6 : f32 to vector<8x128xf32>
    %8 = arith.mulf %7, %6 : vector<8x128xf32>
    %9 = arith.maximumf %6, %8 : vector<8x128xf32>
    %c1 = arith.constant 1 : index
    %c0_7 = arith.constant 0 : index
    %c0_8 = arith.constant 0 : index
    %10 = vector.load %arg2[%c1, %c0_7, %c0_8] : memref<3x128x128xf32, #tpu.memory_space<vmem>>, vector<1x128x128xf32>
    %11 = vector.shape_cast %10 : vector<1x128x128xf32> to vector<128x128xf32>
    %cst_9 = arith.constant dense<0.000000e+00> : vector<8x128xf32>
    %12 = tpu.matmul %9, %11, %cst_9 {dimension_numbers = #tpu.dot_dimension_numbers<[1], [0], [0], [1], [0, 0, 1, 1], [], []>} : vector<8x128xf32>, vector<128x128xf32>, vector<8x128xf32> -> vector<8x128xf32>
    %c1_10 = arith.constant 1 : index
    %c0_11 = arith.constant 0 : index
    %13 = vector.load %arg3[%c1_10, %c0_11] : memref<8x128xf32, #tpu.memory_space<vmem>>, vector<1x128xf32>
    %14 = vector.broadcast %13 : vector<1x128xf32> to vector<8x128xf32>
    %15 = arith.addf %12, %14 : vector<8x128xf32>
    %cst_12 = arith.constant 0.00999999977 : f32
    %16 = vector.broadcast %cst_12 : f32 to vector<8x128xf32>
    %17 = arith.mulf %16, %15 : vector<8x128xf32>
    %18 = arith.maximumf %15, %17 : vector<8x128xf32>
    %c2 = arith.constant 2 : index
    %c0_13 = arith.constant 0 : index
    %c0_14 = arith.constant 0 : index
    %19 = vector.load %arg2[%c2, %c0_13, %c0_14] : memref<3x128x128xf32, #tpu.memory_space<vmem>>, vector<1x128x128xf32>
    %20 = vector.shape_cast %19 : vector<1x128x128xf32> to vector<128x128xf32>
    %cst_15 = arith.constant dense<0.000000e+00> : vector<8x128xf32>
    %21 = tpu.matmul %18, %20, %cst_15 {dimension_numbers = #tpu.dot_dimension_numbers<[1], [0], [0], [1], [0, 0, 1, 1], [], []>} : vector<8x128xf32>, vector<128x128xf32>, vector<8x128xf32> -> vector<8x128xf32>
    %c2_16 = arith.constant 2 : index
    %c0_17 = arith.constant 0 : index
    %22 = vector.load %arg3[%c2_16, %c0_17] : memref<8x128xf32, #tpu.memory_space<vmem>>, vector<1x128xf32>
    %23 = vector.broadcast %22 : vector<1x128xf32> to vector<8x128xf32>
    %24 = arith.addf %21, %23 : vector<8x128xf32>
    %cst_18 = arith.constant 0.00999999977 : f32
    %25 = vector.broadcast %cst_18 : f32 to vector<8x128xf32>
    %26 = arith.mulf %25, %24 : vector<8x128xf32>
    %27 = arith.maximumf %24, %26 : vector<8x128xf32>
    %c3 = arith.constant 3 : index
    %c0_19 = arith.constant 0 : index
    %28 = vector.load %arg3[%c3, %c0_19] : memref<8x128xf32, #tpu.memory_space<vmem>>, vector<1x128xf32>
    %29 = vector.broadcast %28 : vector<1x128xf32> to vector<8x128xf32>
    %30 = arith.mulf %27, %29 : vector<8x128xf32>
    %cst_20 = arith.constant dense<0.000000e+00> : vector<8xf32>
    %31 = vector.multi_reduction <add>, %30, %cst_20 [1] : vector<8x128xf32> to vector<8xf32>
    %32 = vector.shape_cast %31 : vector<8xf32> to vector<8x1xf32>
    %c4 = arith.constant 4 : index
    %c0_21 = arith.constant 0 : index
    %33 = vector.load %arg3[%c4, %c0_21] : memref<8x128xf32, #tpu.memory_space<vmem>>, vector<1x1xf32>
    %34 = vector.broadcast %33 : vector<1x1xf32> to vector<8x1xf32>
    %35 = arith.addf %32, %34 : vector<8x1xf32>
    %c0_22 = arith.constant 0 : index
    %c0_23 = arith.constant 0 : index
    %36 = vector.load %arg4[%c0_22, %c0_23] : memref<8x1xf32, #tpu.memory_space<vmem>>, vector<8x1xf32>
    tpu.vector_store %arg4[%c0_22, %c0_23], %35 {strides = array<i32>} : memref<8x1xf32, #tpu.memory_space<vmem>>, vector<8x1xf32>,
    return
  }
  func.func @transform_0(%arg0: i32) -> (i32, i32) {
    %c0_i32 = arith.constant 0 : i32
    %c0_i32_0 = arith.constant 0 : i32
    return %arg0, %c0_i32 : i32, i32
  }
  func.func @transform_1(%arg0: i32) -> (i32, i32, i32) {
    %c0_i32 = arith.constant 0 : i32
    %c0_i32_0 = arith.constant 0 : i32
    %c0_i32_1 = arith.constant 0 : i32
    %c0_i32_2 = arith.constant 0 : i32
    return %c0_i32, %c0_i32_0, %c0_i32_1 : i32, i32, i32
  }
  func.func @transform_2(%arg0: i32) -> (i32, i32) {
    %c0_i32 = arith.constant 0 : i32
    %c0_i32_0 = arith.constant 0 : i32
    %c0_i32_1 = arith.constant 0 : i32
    return %c0_i32, %c0_i32_0 : i32, i32
  }
  func.func @transform_3(%arg0: i32) -> (i32, i32) {
    %c0_i32 = arith.constant 0 : i32
    %c0_i32_0 = arith.constant 0 : i32
    return %arg0, %c0_i32 : i32, i32
  }
}

</mosaic_0001>

<bundles_post_ra>
// kernel: simple_connected_multiple_forward.2
= control target key start
LH: loop header
LB: loop body
LE: loop exit
PB: predicated region body
PF: predicated region fallthrough
CT: control target
= control target key end

     0   :  { %s312_s0 = inlined_call_operand.hbm [shape: f32[3,128,128], index: 0, kind: input, shape index: {}]   ;;  %s313_s1 = inlined_call_operand.hbm [shape: f32[8,128], index: 1, kind: input, shape index: {}]   ;;  %s314_s2 = inlined_call_operand.vmem [shape: f32[1,21], index: 2, kind: input, shape index: {}]   ;;  %s315_s3 = inlined_call_operand.<no memory space> [shape: f32[], index: 3, kind: input, shape index: {}]   ;;  %s316_s4 = inlined_call_operand.vmem [shape: f32[8,1], index: 4, kind: output, shape index: {}]  }
   0x1   :  { %v9_v0 = vstv %s315_s3 }
   0x2   :  { %10 = vsyncpa [#allocation8], 0  ;;  %s18_s19 = sshll.u32 %s312_s0, 4  ;;  %s19_s19 = int_to_ptr.hbm [resolvable:$true] %s18_s19 }
   0x3   :  { %11 = vsyncpa [#allocation10], 0  ;;  %s260_s20 = smov [#allocation7]   ;;  %s32_s24 = sshll.u32 %s313_s1, 4  ;;  %s33_s24 = int_to_ptr.hbm [resolvable:$true] %s32_s24 }
   0x4   :  { %s20_s21 = sshll.u32 %s260_s20, 4  ;;  %s261_s25 = smov 128   ;;  %s21_s21 = int_to_ptr.vmem [resolvable:$true] %s20_s21 }
   0x5   :  { %s262_s26 = smov 8   ;;  %s263_s27 = smov [#allocation9]  }
   0x6   :  { %26 = dma.hbm_to_vmem [thread:$0]  %s19_s19, 6144, %s21_s21, [#allocation8], %s261_s25, %s261_s25, %s262_s26  }
   0x7   :  { %s34_s28 = sshll.u32 %s263_s27, 4  ;;  %s35_s28 = int_to_ptr.vmem [resolvable:$true] %s34_s28 }
   0x8   :  { %37 = dma.hbm_to_vmem [thread:$0]  %s33_s24, 128, %s35_s28, [#allocation10]  }
   0x9   :  { %256 = dma.done.wait [#allocation8], 6144  }
   0xa   :  { %257 = vsyncadd [#allocation8], 4294961152 }
   0xb   :  { %258 = dma.done.wait [#allocation10], 128  }
   0xc   :  { %259 = vsyncadd [#allocation10], 4294967168  ;;  %v76_v1 = vld [vmem:[#allocation7 + $0x78] sm:$0xff]  ;;  %v75_v2 = vld [vmem:[#allocation7 + $0x70] sm:$0xff]  ;;  %v47_v16 = vlaneseq  ;;  %vm191_vm2 = vcmask 7168  }
   0xd   :  { %79 = vmatpush.msra.mxu0 %v76_v1  ;;  %v74_v3 = vld [vmem:[#allocation7 + $0x68] sm:$0xff]  ;;  %v73_v4 = vld [vmem:[#allocation7 + $0x60] sm:$0xff]  ;;  %v117_v5 = vld [vmem:[#allocation7 + $0xf8] sm:$0xff] }
   0xe   :  { %v72_v6 = vld [vmem:[#allocation7 + $0x58] sm:$0xff]  ;;  %120 = vmatpush.msra.mxu1 %v117_v5  ;;  %v116_v7 = vld [vmem:[#allocation7 + $0xf0] sm:$0xff]  ;;  %v115_v8 = vld [vmem:[#allocation7 + $0xe8] sm:$0xff]  ;;  %v48_v21 = vshrl.u32 %v47_v16, 7  ;;  %v53_v26 = vand.u32 127, %v47_v16 }
   0xf   :  { %80 = vmatpush.msra.mxu0 %v75_v2  ;;  %v71_v9 = vld [vmem:[#allocation7 + $0x50] sm:$0xff]  ;;  %v114_v10 = vld [vmem:[#allocation7 + $0xe0] sm:$0xff]  ;;  %v70_v11 = vld [vmem:[#allocation7 + $0x48] sm:$0xff] }
  0x10   :  { %121 = vmatpush.msra.mxu1 %v116_v7  ;;  %v113_v12 = vld [vmem:[#allocation7 + $0xd8] sm:$0xff]  ;;  %v69_v13 = vld [vmem:[#allocation7 + $0x40] sm:$0xff]  ;;  %v112_v14 = vld [vmem:[#allocation7 + $0xd0] sm:$0xff]  ;;  %vm50_vm0 = vcmp.lt.s32.totalorder %v48_v21, 1  ;;  %vm55_vm1 = vcmp.lt.s32.totalorder %v53_v26, 21 }
  0x11   :  { %81 = vmatpush.msra.mxu0 %v74_v3  ;;  %v68_v15 = vld [vmem:[#allocation7 + $0x38] sm:$0xff]  ;;  %v111_v17 = vld [vmem:[#allocation7 + $0xc8] sm:$0xff]  ;;  %v67_v18 = vld [vmem:[#allocation7 + $0x30] sm:$0xff] }
  0x12   :  { %122 = vmatpush.msra.mxu1 %v115_v8  ;;  %v110_v19 = vld [vmem:[#allocation7 + $0xc0] sm:$0xff]  ;;  %v66_v20 = vld [vmem:[#allocation7 + $0x28] sm:$0xff]  ;;  %v109_v22 = vld [vmem:[#allocation7 + $0xb8] sm:$0xff] }
  0x13   :  { %82 = vmatpush.msra.mxu0 %v73_v4  ;;  %v65_v23 = vld [vmem:[#allocation7 + $0x20] sm:$0xff]  ;;  %v108_v24 = vld [vmem:[#allocation7 + $0xb0] sm:$0xff]  ;;  %v64_v25 = vld [vmem:[#allocation7 + $0x18] sm:$0xff] }
  0x14   :  { %123 = vmatpush.msra.mxu1 %v114_v10  ;;  %v46_v27 = vld [vmem:[%s314_s2] sm:$0x1]  ;;  %v107_v28 = vld [vmem:[#allocation7 + $0xa8] sm:$0xff]  ;;  %v63_v29 = vld [vmem:[#allocation7 + $0x10] sm:$0xff] }
  0x15   :  { %83 = vmatpush.msra.mxu0 %v72_v6  ;;  %v106_v30 = vld [vmem:[#allocation7 + $0xa0] sm:$0xff]  ;;  %v62_v31 = vld [vmem:[#allocation7 + $0x8] sm:$0xff]  ;;  %v51_v32 = vsel %vm50_vm0, %v46_v27, %v9_v0  ;;  %v105_v35 = vld [vmem:[#allocation7 + $0x98] sm:$0xff] }
  0x16   :  { %124 = vmatpush.msra.mxu1 %v113_v12  ;;  %v61_v33 = vld [vmem:[#allocation7] sm:$0xff]  ;;  %v56_v34 = vsel %vm55_vm1, %v51_v32, %v9_v0  ;;  %v104_v36 = vld [vmem:[#allocation7 + $0x90] sm:$0xff]  ;;  %v103_v37 = vld [vmem:[#allocation7 + $0x88] sm:$0xff] }
  0x17   :  { %84 = vmatpush.msra.mxu0 %v71_v9  ;;  %v102_v38 = vld [vmem:[#allocation7 + $0x80] sm:$0xff]  ;;  %v158_v39 = vld [vmem:[#allocation7 + $0x178] sm:$0xff]  ;;  %v157_v40 = vld [vmem:[#allocation7 + $0x170] sm:$0xff] }
  0x18   :  { %125 = vmatpush.msra.mxu1 %v112_v14  ;;  %161 = vmatpush.msra.mxu2 %v158_v39  ;;  %v156_v41 = vld [vmem:[#allocation7 + $0x168] sm:$0xff]  ;;  %v155_v42 = vld [vmem:[#allocation7 + $0x160] sm:$0xff]  ;;  %v154_v43 = vld [vmem:[#allocation7 + $0x158] sm:$0xff] }
  0x19   :  { %85 = vmatpush.msra.mxu0 %v70_v11  ;;  %v153_v44 = vld [vmem:[#allocation7 + $0x150] sm:$0xff]  ;;  %v152_v45 = vld [vmem:[#allocation7 + $0x148] sm:$0xff]  ;;  %v151_v46 = vld [vmem:[#allocation7 + $0x140] sm:$0xff] }
  0x1a   :  { %126 = vmatpush.msra.mxu1 %v111_v17  ;;  %162 = vmatpush.msra.mxu2 %v157_v40  ;;  %v150_v47 = vld [vmem:[#allocation7 + $0x138] sm:$0xff]  ;;  %v149_v48 = vld [vmem:[#allocation7 + $0x130] sm:$0xff]  ;;  %v148_v49 = vld [vmem:[#allocation7 + $0x128] sm:$0xff] }
  0x1b   :  { %86 = vmatpush.msra.mxu0 %v69_v13  ;;  %v147_v50 = vld [vmem:[#allocation7 + $0x120] sm:$0xff]  ;;  %v146_v56 = vld [vmem:[#allocation7 + $0x118] sm:$0xff]  ;;  %v145_v57 = vld [vmem:[#allocation7 + $0x110] sm:$0xff] }
  0x1c   :  { %127 = vmatpush.msra.mxu1 %v110_v19  ;;  %163 = vmatpush.msra.mxu2 %v156_v41  ;;  %v203_v51 = vld [vmem:[#allocation9] ss:$0 sm:$0xff]  ;;  %v144_v58 = vld [vmem:[#allocation7 + $0x108] sm:$0xff]  ;;  %v204_v60 = vld [vmem:[#allocation9 + $0x1] ss:$0 sm:$0xff] }
  0x1d   :  { %87 = vmatpush.msra.mxu0 %v68_v15  ;;  %v143_v59 = vld [vmem:[#allocation7 + $0x100] sm:$0xff] }
  0x1e   :  { %128 = vmatpush.msra.mxu1 %v109_v22  ;;  %164 = vmatpush.msra.mxu2 %v155_v42  ;;  %v205_v1 = vld [vmem:[#allocation9 + $0x2] ss:$0 sm:$0xff]  ;;  %v206_v5 = vld [vmem:[#allocation9 + $0x3] ss:$0 sm:$0xff]  ;;  %v207_v8 = vld [vmem:[#allocation9 + $0x4] ss:$0 sm:$0xff] }
  0x1f   :  { %88 = vmatpush.msra.mxu0 %v67_v18 }
  0x20   :  { %129 = vmatpush.msra.mxu1 %v108_v24  ;;  %165 = vmatpush.msra.mxu2 %v154_v43 }
  0x21   :  { %89 = vmatpush.msra.mxu0 %v66_v20 }
  0x22   :  { %130 = vmatpush.msra.mxu1 %v107_v28  ;;  %166 = vmatpush.msra.mxu2 %v153_v44 }
  0x23   :  { %90 = vmatpush.msra.mxu0 %v65_v23 }
  0x24   :  { %131 = vmatpush.msra.mxu1 %v106_v30  ;;  %167 = vmatpush.msra.mxu2 %v152_v45 }
  0x25   :  { %91 = vmatpush.msra.mxu0 %v64_v25 }
  0x26   :  { %132 = vmatpush.msra.mxu1 %v105_v35  ;;  %168 = vmatpush.msra.mxu2 %v151_v46 }
  0x27   :  { %92 = vmatpush.msra.mxu0 %v63_v29 }
  0x28   :  { %133 = vmatpush.msra.mxu1 %v104_v36  ;;  %169 = vmatpush.msra.mxu2 %v150_v47 }
  0x29   :  { %93 = vmatpush.msra.mxu0 %v62_v31 }
  0x2a   :  { %134 = vmatpush.msra.mxu1 %v103_v37  ;;  %170 = vmatpush.msra.mxu2 %v149_v48 }
  0x2b   :  { %94 = vmatpush.msra.mxu0 %v61_v33 }
  0x2c   :  { %95 = vmatmul.f32.vlgmr.msra.gmra.mxu0 %v56_v34  ;;  %135 = vmatpush.msra.mxu1 %v102_v38 }
  0x2d   :  { %171 = vmatpush.msra.mxu2 %v148_v49 }
  0x2f   :  { %172 = vmatpush.msra.mxu2 %v147_v50 }
  0x31   :  { %173 = vmatpush.msra.mxu2 %v146_v56 }
  0x33   :  { %174 = vmatpush.msra.mxu2 %v145_v57 }
  0x35   :  { %175 = vmatpush.msra.mxu2 %v144_v58 }
  0x37   :  { %176 = vmatpush.msra.mxu2 %v143_v59 }
  0xa9   :  { %v96_v52 = vpop.f32.mrf.mxu0 }
  0xaa   :  { %v97_v53 = vadd.f32 %v203_v51, %v96_v52 }
  0xac   :  { %v99_v54 = vmul.f32 0.01, %v97_v53 }
  0xae   :  { %v100_v55 = vmax.f32 %v97_v53, %v99_v54 }
  0xb0   :  { %136 = vmatmul.f32.vlgmr.msra.gmra.mxu1 %v100_v55 }
 0x12d   :  { %v137_v61 = vpop.f32.mrf.mxu1 }
 0x12e   :  { %v138_v62 = vadd.f32 %v204_v60, %v137_v61 }
 0x130   :  { %v140_v63 = vmul.f32 0.01, %v138_v62 }
 0x132   :  { %v141_v0 = vmax.f32 %v138_v62, %v140_v63 }
 0x134   :  { %177 = vmatmul.f32.vlgmr.msra.gmra.mxu2 %v141_v0 }
 0x1b7   :  { %v178_v2 = vpop.f32.mrf.mxu2 }
 0x1b8   :  { %v179_v3 = vadd.f32 %v205_v1, %v178_v2 }
 0x1ba   :  { %v181_v4 = vmul.f32 0.01, %v179_v3 }
 0x1bc   :  { %v182_v6 = vmax.f32 %v179_v3, %v181_v4 }
 0x1be   :  { %v185_v7 = vmul.f32 %v206_v5, %v182_v6 }
 0x1c0   :  { %186 = vadd.xlane.f32.xlu0 %v185_v7 }
 0x233   :  { %v187_v9 = vpop.xlane.xlu0 %186 }
 0x234   :  { %v190_v10 = vadd.f32 %v207_v8, %v187_v9 }
 0x236   :  { %192 = vst.msk [vmem:[%s316_s4] sm:$0xff] %vm191_vm2, %v190_v10 }
 0x237   :  { %197 = vsyncpa [#allocation8], 1 }
 0x238   :  { %198 = vsyncpa [#allocation10], 1 }

</bundles_post_ra>
